<compile_context>
chip_gen: v5e
topology: v5e:2x2
jax: 0.10.0
libtpu: 0.0.40
codegen_flags: <defaults>
</compile_context>

<pallas_src>
import functools

import jax
import jax.numpy as jnp
from jax import lax
from jax.experimental import pallas as pl
from jax.experimental.pallas import tpu as pltpu


LEAKY_SLOPE = 0.01      # PyTorch nn.LeakyReLU default negative_slope
LANE = 128              # TPU lane width
MAX_TILE_B = 2048       # upper bound on batch rows per grid step


# --------------------------------------------------------------------------
# Kernel
# --------------------------------------------------------------------------
def _mlp_kernel(hidden_depth, *refs):
    """Runs the whole MLP on one (tile_b, input_size) batch tile.

    refs = (x, w_in, b_in, [w_hid, b_hid,] w_out, b_out, out)
    out_ref is a lane-packed (out_size, tile_b) slab.
    """
    if hidden_depth > 0:
        (x_ref, w_in_ref, b_in_ref, w_hid_ref, b_hid_ref,
         w_out_ref, b_out_ref, out_ref) = refs
    else:
        (x_ref, w_in_ref, b_in_ref, w_out_ref, b_out_ref, out_ref) = refs
        w_hid_ref = b_hid_ref = None

    h = x_ref[...].astype(jnp.float32)

    # Input layer + LeakyReLU.
    h = jnp.dot(h, w_in_ref[...], preferred_element_type=jnp.float32) + b_in_ref[...]
    h = jnp.where(h > 0, h, LEAKY_SLOPE * h)

    # Hidden layers (statically unrolled; weights live in one stacked ref).
    for d in range(hidden_depth):
        h = jnp.dot(h, w_hid_ref[d], preferred_element_type=jnp.float32) + b_hid_ref[d]
        h = jnp.where(h > 0, h, LEAKY_SLOPE * h)

    # Output layer computed directly in (out_size, tile_b) layout:
    #   z[o, b] = sum_k w_out[o, k] * h[b, k]
    # i.e. A @ B^T -- the MXU handles the transposed operand natively, so no
    # transpose/relayout materializes.  Store is lane-dense (tile_b is a
    # multiple of 128 whenever the grid has >1 step) with no zero padding, so
    # exp (single EUP slot) only runs on real outputs and the HBM writeback is
    # out_size * B * 4 bytes instead of a 128-wide slab.
    z = lax.dot_general(
        w_out_ref[...], h,
        dimension_numbers=(((1,), (1,)), ((), ())),
        preferred_element_type=jnp.float32) + b_out_ref[...]
    # Exact sigmoid (no approx reciprocal -- EUP has huge slack here).
    out_ref[...] = (1.0 / (1.0 + jnp.exp(-z))).astype(out_ref.dtype)


# --------------------------------------------------------------------------
# Parameter packing (per-layer lists -> stacked operands)
# --------------------------------------------------------------------------
def pack_params(weights, biases):
    """weights[i]: (in_i, out_i) pre-transposed; biases[i]: (1, out_i)."""
    assert len(weights) == len(biases) and len(weights) >= 2
    hidden_depth = len(weights) - 2

    w_in = weights[0].astype(jnp.float32)                       # (in, H)
    b_in = biases[0].reshape(1, -1).astype(jnp.float32)         # (1, H)

    if hidden_depth > 0:
        w_hid = jnp.stack([w.astype(jnp.float32) for w in weights[1:-1]])          # (D, H, H)
        b_hid = jnp.stack([b.reshape(1, -1).astype(jnp.float32) for b in biases[1:-1]])  # (D, 1, H)
    else:
        w_hid = None
        b_hid = None

    out_size = weights[-1].shape[1]
    # Last layer kept in PyTorch (out, in) layout so the kernel can do the
    # A @ B^T contraction and produce a lane-packed (out_size, tile_b) result.
    w_out = weights[-1].T.astype(jnp.float32)                   # (out, H)
    b_out = biases[-1].reshape(-1, 1).astype(jnp.float32)       # (out, 1)

    return {
        "w_in": w_in, "b_in": b_in,
        "w_hid": w_hid, "b_hid": b_hid,
        "w_out": w_out, "b_out": b_out,
        "hidden_depth": hidden_depth,
        "out_size": out_size,
    }


# --------------------------------------------------------------------------
# Tiling choice + wrapper
# --------------------------------------------------------------------------
def _choose_tiling(batch):
    """Pick (n_tiles, tile_b).

    * Minimize grid steps (per-step overhead dominates these tiny matmuls).
    * Keep >= 2 steps for batches big enough to split so the "parallel" batch
      axis can be sharded across v7x's two TensorCores.
    * tile_b must be a multiple of 128 whenever n_tiles > 1 so the lane-packed
      (out_size, tile_b) output block stays 128-aligned (unmasked stores).
    """
    if batch <= 256:
        return 1, batch                         # single full-array tile, no padding
    n_tiles = max(2, pl.cdiv(batch, MAX_TILE_B))
    tile_b = ((pl.cdiv(batch, n_tiles) + LANE - 1) // LANE) * LANE
    return n_tiles, tile_b


def mlp_forward(x, packed):
    """x: (B, input_size) float32. Returns (B, output_size) float32."""
    batch, in_size = x.shape
    depth = packed["hidden_depth"]
    out_size = packed["out_size"]

    n_tiles, tile_b = _choose_tiling(batch)
    b_pad = n_tiles * tile_b
    if b_pad != batch:
        # Only taken when batch > 256 and not splittable into 128-aligned
        # tiles; for typical batches (e.g. 512 -> 2x256) no host pad is issued.
        x = jnp.pad(x, ((0, b_pad - batch), (0, 0)))

    operands = [x, packed["w_in"], packed["b_in"]]
    if depth > 0:
        operands += [packed["w_hid"], packed["b_hid"]]
    operands += [packed["w_out"], packed["b_out"]]

    def _const_spec(arr):
        # Full-array block, same block index every grid step (stays resident).
        return pl.BlockSpec(arr.shape, lambda i, nd=arr.ndim: (0,) * nd)

    in_specs = [pl.BlockSpec((tile_b, in_size), lambda i: (i, 0))]
    in_specs += [_const_spec(op) for op in operands[1:]]

    # Lane-packed output: (out_size, b_pad); each grid step fills a disjoint
    # 128-aligned lane slab of every output row.
    out_spec = pl.BlockSpec((out_size, tile_b), lambda i: (0, i))
    out_shape = jax.ShapeDtypeStruct((out_size, b_pad), jnp.float32)

    y = pl.pallas_call(
        functools.partial(_mlp_kernel, depth),
        grid=(n_tiles,),
        in_specs=in_specs,
        out_specs=out_spec,
        out_shape=out_shape,
        compiler_params=pltpu.CompilerParams(
            dimension_semantics=("parallel",)),   # megacore-splittable on v7x
    )(*operands)

    # (out_size, b_pad) -> (batch, out_size); for out_size == 1 this is just a
    # reshape, not a real transpose.
    return y[:, :batch].T


# --------------------------------------------------------------------------
# Init (matches nn.init.uniform_(param, -1, +1)) and plain-JAX reference
# --------------------------------------------------------------------------
def init_params(key, input_size, hidden_size, hidden_depth, output_size):
    dims = [input_size] + [hidden_size] * (hidden_depth + 1) + [output_size]
    weights, biases = [], []
    for i in range(len(dims) - 1):
        key, kw, kb = jax.random.split(key, 3)
        # PyTorch Linear weight is (out, in); we store it transposed (in, out).
        w = jax.random.uniform(kw, (dims[i], dims[i + 1]),
                               minval=-1.0, maxval=1.0, dtype=jnp.float32)
        b = jax.random.uniform(kb, (1, dims[i + 1]),
                               minval=-1.0, maxval=1.0, dtype=jnp.float32)
        weights.append(w)
        biases.append(b)
    return weights, biases


def reference_forward(x, weights, biases):
    h = x
    n = len(weights)
    for i, (w, b) in enumerate(zip(weights, biases)):
        h = h @ w + b
        if i < n - 1:
            h = jnp.where(h > 0, h, LEAKY_SLOPE * h)
        else:
            h = jax.nn.sigmoid(h)
    return h


# --------------------------------------------------------------------------
# Self-test
# --------------------------------------------------------------------------
if __name__ == "__main__":
    key = jax.random.PRNGKey(0)

    # Case 1: batched forward, grid=(2,), 256-row lane-aligned tiles, out=1.
    batch, input_size, hidden_size, hidden_depth, output_size = 512, 8, 32, 2, 1
    key, kx, kp = jax.random.split(key, 3)
    x = jax.random.normal(kx, (batch, input_size), dtype=jnp.float32)
    weights, biases = init_params(kp, input_size, hidden_size,
                                  hidden_depth, output_size)
    packed = pack_params(weights, biases)
    out = jax.block_until_ready(mlp_forward(x, packed))
    ref = reference_forward(x, weights, biases)
    assert out.shape == (batch, output_size)
    assert jnp.allclose(out, ref, atol=1e-4, rtol=1e-4), "case 1 mismatch"

    # Case 2: odd small batch, no hidden layers, multi-output -> single-tile path.
    batch2, in2, hid2, depth2, out2 = 13, 5, 32, 0, 2
    key, kx2, kp2 = jax.random.split(key, 3)
    x2 = jax.random.normal(kx2, (batch2, in2), dtype=jnp.float32)
    w2, b2 = init_params(kp2, in2, hid2, depth2, out2)
    packed2 = pack_params(w2, b2)
    o2 = jax.block_until_ready(mlp_forward(x2, packed2))
    r2 = reference_forward(x2, w2, b2)
    assert o2.shape == (batch2, out2)
    assert jnp.allclose(o2, r2, atol=1e-4, rtol=1e-4), "case 2 mismatch"

    print("KERNEL_OK")
</pallas_src>

<mosaic_0001>
module attributes {stable_mosaic.version = 11 : i64} {
  func.func @_mlp_kernel(%arg0: i32, %arg1: memref<256x8xf32, #tpu.memory_space<vmem>>, %arg2: memref<8x32xf32, #tpu.memory_space<vmem>>, %arg3: memref<1x32xf32, #tpu.memory_space<vmem>>, %arg4: memref<2x32x32xf32, #tpu.memory_space<vmem>>, %arg5: memref<2x1x32xf32, #tpu.memory_space<vmem>>, %arg6: memref<1x32xf32, #tpu.memory_space<vmem>>, %arg7: memref<1x1xf32, #tpu.memory_space<vmem>>, %arg8: memref<1x256xf32, #tpu.memory_space<vmem>>) attributes {dimension_semantics = [#tpu.dimension_semantics<parallel>], iteration_bounds = array<i64: 2>, scalar_prefetch = 0 : i64, scratch_operands = 0 : i64, tpu.core_type = #tpu.core_type<tc>, window_params = [{transform_indices = @transform_0, window_bounds = array<i64: 256, 8>}, {pipeline_mode = #tpu.pipeline_mode<synchronous>, transform_indices = @transform_1, window_bounds = array<i64: 8, 32>}, {pipeline_mode = #tpu.pipeline_mode<synchronous>, transform_indices = @transform_2, window_bounds = array<i64: 1, 32>}, {pipeline_mode = #tpu.pipeline_mode<synchronous>, transform_indices = @transform_3, window_bounds = array<i64: 2, 32, 32>}, {pipeline_mode = #tpu.pipeline_mode<synchronous>, transform_indices = @transform_4, window_bounds = array<i64: 2, 1, 32>}, {pipeline_mode = #tpu.pipeline_mode<synchronous>, transform_indices = @transform_5, window_bounds = array<i64: 1, 32>}, {pipeline_mode = #tpu.pipeline_mode<synchronous>, transform_indices = @transform_6, window_bounds = array<i64: 1, 1>}, {transform_indices = @transform_7, window_bounds = array<i64: 1, 256>}]} {
    %c0 = arith.constant 0 : index
    %c0_0 = arith.constant 0 : index
    %0 = vector.load %arg1[%c0, %c0_0] : memref<256x8xf32, #tpu.memory_space<vmem>>, vector<256x8xf32>
    %c0_1 = arith.constant 0 : index
    %c0_2 = arith.constant 0 : index
    %1 = vector.load %arg2[%c0_1, %c0_2] : memref<8x32xf32, #tpu.memory_space<vmem>>, vector<8x32xf32>
    %cst = arith.constant dense<0.000000e+00> : vector<256x32xf32>
    %2 = tpu.matmul %0, %1, %cst {dimension_numbers = #tpu.dot_dimension_numbers<[1], [0], [0], [1], [0, 0, 1, 1], [], []>} : vector<256x8xf32>, vector<8x32xf32>, vector<256x32xf32> -> vector<256x32xf32>
    %c0_3 = arith.constant 0 : index
    %c0_4 = arith.constant 0 : index
    %3 = vector.load %arg3[%c0_3, %c0_4] : memref<1x32xf32, #tpu.memory_space<vmem>>, vector<1x32xf32>
    %4 = vector.broadcast %3 : vector<1x32xf32> to vector<256x32xf32>
    %5 = arith.addf %2, %4 : vector<256x32xf32>
    %cst_5 = arith.constant 0.000000e+00 : f32
    %6 = vector.broadcast %cst_5 : f32 to vector<256x32xf32>
    %7 = arith.cmpf ogt, %5, %6 : vector<256x32xf32>
    %cst_6 = arith.constant 0.00999999977 : f32
    %8 = vector.broadcast %cst_6 : f32 to vector<256x32xf32>
    %9 = arith.mulf %8, %5 : vector<256x32xf32>
    %10 = arith.select %7, %5, %9 : vector<256x32xi1>, vector<256x32xf32>
    %c0_7 = arith.constant 0 : index
    %c0_8 = arith.constant 0 : index
    %c0_9 = arith.constant 0 : index
    %11 = vector.load %arg4[%c0_7, %c0_8, %c0_9] : memref<2x32x32xf32, #tpu.memory_space<vmem>>, vector<1x32x32xf32>
    %12 = vector.shape_cast %11 : vector<1x32x32xf32> to vector<32x32xf32>
    %cst_10 = arith.constant dense<0.000000e+00> : vector<256x32xf32>
    %13 = tpu.matmul %10, %12, %cst_10 {dimension_numbers = #tpu.dot_dimension_numbers<[1], [0], [0], [1], [0, 0, 1, 1], [], []>} : vector<256x32xf32>, vector<32x32xf32>, vector<256x32xf32> -> vector<256x32xf32>
    %c0_11 = arith.constant 0 : index
    %c0_12 = arith.constant 0 : index
    %c0_13 = arith.constant 0 : index
    %14 = vector.load %arg5[%c0_11, %c0_12, %c0_13] : memref<2x1x32xf32, #tpu.memory_space<vmem>>, vector<1x1x32xf32>
    %15 = vector.shape_cast %14 : vector<1x1x32xf32> to vector<1x32xf32>
    %16 = vector.broadcast %15 : vector<1x32xf32> to vector<256x32xf32>
    %17 = arith.addf %13, %16 : vector<256x32xf32>
    %cst_14 = arith.constant 0.000000e+00 : f32
    %18 = vector.broadcast %cst_14 : f32 to vector<256x32xf32>
    %19 = arith.cmpf ogt, %17, %18 : vector<256x32xf32>
    %cst_15 = arith.constant 0.00999999977 : f32
    %20 = vector.broadcast %cst_15 : f32 to vector<256x32xf32>
    %21 = arith.mulf %20, %17 : vector<256x32xf32>
    %22 = arith.select %19, %17, %21 : vector<256x32xi1>, vector<256x32xf32>
    %c1 = arith.constant 1 : index
    %c0_16 = arith.constant 0 : index
    %c0_17 = arith.constant 0 : index
    %23 = vector.load %arg4[%c1, %c0_16, %c0_17] : memref<2x32x32xf32, #tpu.memory_space<vmem>>, vector<1x32x32xf32>
    %24 = vector.shape_cast %23 : vector<1x32x32xf32> to vector<32x32xf32>
    %cst_18 = arith.constant dense<0.000000e+00> : vector<256x32xf32>
    %25 = tpu.matmul %22, %24, %cst_18 {dimension_numbers = #tpu.dot_dimension_numbers<[1], [0], [0], [1], [0, 0, 1, 1], [], []>} : vector<256x32xf32>, vector<32x32xf32>, vector<256x32xf32> -> vector<256x32xf32>
    %c1_19 = arith.constant 1 : index
    %c0_20 = arith.constant 0 : index
    %c0_21 = arith.constant 0 : index
    %26 = vector.load %arg5[%c1_19, %c0_20, %c0_21] : memref<2x1x32xf32, #tpu.memory_space<vmem>>, vector<1x1x32xf32>
    %27 = vector.shape_cast %26 : vector<1x1x32xf32> to vector<1x32xf32>
    %28 = vector.broadcast %27 : vector<1x32xf32> to vector<256x32xf32>
    %29 = arith.addf %25, %28 : vector<256x32xf32>
    %cst_22 = arith.constant 0.000000e+00 : f32
    %30 = vector.broadcast %cst_22 : f32 to vector<256x32xf32>
    %31 = arith.cmpf ogt, %29, %30 : vector<256x32xf32>
    %cst_23 = arith.constant 0.00999999977 : f32
    %32 = vector.broadcast %cst_23 : f32 to vector<256x32xf32>
    %33 = arith.mulf %32, %29 : vector<256x32xf32>
    %34 = arith.select %31, %29, %33 : vector<256x32xi1>, vector<256x32xf32>
    %c0_24 = arith.constant 0 : index
    %c0_25 = arith.constant 0 : index
    %35 = vector.load %arg6[%c0_24, %c0_25] : memref<1x32xf32, #tpu.memory_space<vmem>>, vector<1x32xf32>
    %cst_26 = arith.constant dense<0.000000e+00> : vector<1x256xf32>
    %36 = tpu.matmul %35, %34, %cst_26 {dimension_numbers = #tpu.dot_dimension_numbers<[1], [1], [0], [0], [0, 0, 1, 0], [], []>} : vector<1x32xf32>, vector<256x32xf32>, vector<1x256xf32> -> vector<1x256xf32>
    %c0_27 = arith.constant 0 : index
    %c0_28 = arith.constant 0 : index
    %37 = vector.load %arg7[%c0_27, %c0_28] : memref<1x1xf32, #tpu.memory_space<vmem>>, vector<1x1xf32>
    %38 = vector.broadcast %37 : vector<1x1xf32> to vector<1x256xf32>
    %39 = arith.addf %36, %38 : vector<1x256xf32>
    %cst_29 = arith.constant 0.000000e+00 : f32
    %40 = vector.broadcast %cst_29 : f32 to vector<1x256xf32>
    %41 = arith.subf %40, %39 : vector<1x256xf32>
    %42 = math.exp %41 : vector<1x256xf32>
    %cst_30 = arith.constant 1.000000e+00 : f32
    %43 = vector.broadcast %cst_30 : f32 to vector<1x256xf32>
    %44 = arith.addf %43, %42 : vector<1x256xf32>
    %cst_31 = arith.constant 1.000000e+00 : f32
    %45 = vector.broadcast %cst_31 : f32 to vector<1x256xf32>
    %46 = arith.divf %45, %44 : vector<1x256xf32>
    %c0_32 = arith.constant 0 : index
    %c0_33 = arith.constant 0 : index
    %47 = vector.load %arg8[%c0_32, %c0_33] : memref<1x256xf32, #tpu.memory_space<vmem>>, vector<1x256xf32>
    tpu.vector_store %arg8[%c0_32, %c0_33], %46 {strides = array<i32>} : memref<1x256xf32, #tpu.memory_space<vmem>>, vector<1x256xf32>,
    return
  }
  func.func @transform_0(%arg0: i32) -> (i32, i32) {
    %c0_i32 = arith.constant 0 : i32
    %c0_i32_0 = arith.constant 0 : i32
    return %arg0, %c0_i32 : i32, i32
  }
  func.func @transform_1(%arg0: i32) -> (i32, i32) {
    %c0_i32 = arith.constant 0 : i32
    %c0_i32_0 = arith.constant 0 : i32
    %c0_i32_1 = arith.constant 0 : i32
    return %c0_i32, %c0_i32_0 : i32, i32
  }
  func.func @transform_2(%arg0: i32) -> (i32, i32) {
    %c0_i32 = arith.constant 0 : i32
    %c0_i32_0 = arith.constant 0 : i32
    %c0_i32_1 = arith.constant 0 : i32
    return %c0_i32, %c0_i32_0 : i32, i32
  }
  func.func @transform_3(%arg0: i32) -> (i32, i32, i32) {
    %c0_i32 = arith.constant 0 : i32
    %c0_i32_0 = arith.constant 0 : i32
    %c0_i32_1 = arith.constant 0 : i32
    %c0_i32_2 = arith.constant 0 : i32
    return %c0_i32, %c0_i32_0, %c0_i32_1 : i32, i32, i32
  }
  func.func @transform_4(%arg0: i32) -> (i32, i32, i32) {
    %c0_i32 = arith.constant 0 : i32
    %c0_i32_0 = arith.constant 0 : i32
    %c0_i32_1 = arith.constant 0 : i32
    %c0_i32_2 = arith.constant 0 : i32
    return %c0_i32, %c0_i32_0, %c0_i32_1 : i32, i32, i32
  }
  func.func @transform_5(%arg0: i32) -> (i32, i32) {
    %c0_i32 = arith.constant 0 : i32
    %c0_i32_0 = arith.constant 0 : i32
    %c0_i32_1 = arith.constant 0 : i32
    return %c0_i32, %c0_i32_0 : i32, i32
  }
  func.func @transform_6(%arg0: i32) -> (i32, i32) {
    %c0_i32 = arith.constant 0 : i32
    %c0_i32_0 = arith.constant 0 : i32
    %c0_i32_1 = arith.constant 0 : i32
    return %c0_i32, %c0_i32_0 : i32, i32
  }
  func.func @transform_7(%arg0: i32) -> (i32, i32) {
    %c0_i32 = arith.constant 0 : i32
    %c0_i32_0 = arith.constant 0 : i32
    return %c0_i32, %arg0 : i32, i32
  }
}

</mosaic_0001>

<bundles_post_ra>
// kernel: tpu_custom_call.1
= control target key start
LH: loop header
LB: loop body
LE: loop exit
PB: predicated region body
PF: predicated region fallthrough
CT: control target
= control target key end

     0   :  { %s2288_s0 = inlined_call_operand.vmem [shape: f32[512,8], index: 0, kind: input, shape index: {}]   ;;  %s2289_s1 = inlined_call_operand.vmem [shape: f32[8,32], index: 1, kind: input, shape index: {}]   ;;  %s2290_s2 = inlined_call_operand.vmem [shape: f32[1,32], index: 2, kind: input, shape index: {}]   ;;  %s2291_s3 = inlined_call_operand.vmem [shape: f32[2,32,32], index: 3, kind: input, shape index: {}]   ;;  %s2292_s4 = inlined_call_operand.vmem [shape: f32[2,1,32], index: 4, kind: input, shape index: {}]   ;;  %s2293_s5 = inlined_call_operand.vmem [shape: f32[1,32], index: 5, kind: input, shape index: {}]   ;;  %s2294_s6 = inlined_call_operand.<no memory space> [shape: f32[1,1], index: 6, kind: input, shape index: {}]   ;;  %s2295_s7 = inlined_call_operand.hbm [shape: f32[1,512], index: 7, kind: output, shape index: {}]  }
   0x1   :  { %v12_v0 = vstv %s2294_s6 }
   0x2   :  { %13 = vst [vmem:[#allocation2] sm:$0x1] %v12_v0 }
   0x3   :  { %14 = vsyncpa [#allocation4], 0 }
   0x4   :  { %16 = vsyncpa [#allocation4 + $0x1], 0  ;;  %s1831_s26 = smov 0   ;;  %s1833_s27 = smov 0  }
   0x5   :  { %s1835_s28 = smov 0   ;;  %s1837_s29 = smov 0  }
   0x6 LB: > { %s1852_s6 = sadd.s32 4294967295, %s1785_s29   ;;  %s1525_s30 = sadd.s32 4294967294, %s1785_s29   ;;  %s1785_s29 = sphi %s1837_s29, %s2303_s29   ;;  %s1781_s28 = sphi %s1835_s28, %s2302_s28   ;;  %s1777_s27 = sphi %s1833_s27, %s2301_s27   ;;  %s1773_s26 = sphi %s1831_s26, %s2300_s26  }
   0x7   : > { %s1856_s8 = sadd.s32 1, %s1785_s29   ;;  %s181_s9 = sadd.s32 1, %s1781_s28 }
   0x8   : > { %s178_s10 = ssub.s32 %s1785_s29, %s1856_s8  ;;  %p191_p0 = scmp.ne.s32.totalorder %s1781_s28, %s1777_s27 }
   0x9   : > { %p179_p1 = scmp.eq.s32.totalorder %s178_s10, 0  ;;  %p192_p2 = scmp.eq.s32.totalorder %s1852_s6, 1 }
   0xa   : > { %p197_p3 = scmp.ne.s32.totalorder %s1777_s27, %s1773_s26  ;;  %p198_p4 = scmp.eq.s32.totalorder %s1525_s30, 1 }
   0xb   : > { %s1867_s11 = scalar_select %p179_p1, %s1781_s28, %s181_s9  }
   0xc   : > { %p1869_p5 = por %p192_p2, %p191_p0  ;;  %p1873_p6 = por %p198_p4, %p197_p3 }
   0xd   : > { %p1528_p7 = scmp.ge.s32.totalorder %s1785_s29, 1  ;;  %p243_p8 = scmp.lt.s32.totalorder %s1785_s29, 3 }
   0xf   : > { %p244_p9 = pnand %p1528_p7, %p243_p8 }
  0x10   : > { %s1530_s16 = sshll.u32 (!%p244_p9), %s1852_s6, 5  ;;  %s272_s15 = sand.u32 (!%p244_p9), 1, %s1777_s27  }
  0x11   : > { %247 = sbr.rel (%p244_p9) target bundleno = 906 (0x38a), region = 48  ;;  %p276_p10 = scmp.lt.s32.totalorder (!%p244_p9), %s1530_s16, 63 }
  0x12   : > { %s1451_s24 = scalar_lea.sflag (!%p244_p9), [#allocation4], %s272_s15  ;;  %s1743_s10 = scalar_lea.hbm (!%p244_p9), %s2295_s7, 4 }
  0x16   : > { %v314_v1 = vld [vmem:[%s2289_s1] sm:$0xff]  ;;  %s2305_s16 = smov (!%p276_p10, %s1530_s16), 63  ;;  %vm319_vm0 = vcmask 64512   ;;  %v628_v14 = vld [vmem:[%s2291_s3 + $0x18] sm:$0xff]  ;;  %v627_v16 = vld [vmem:[%s2291_s3 + $0x10] sm:$0xff]  ;;  %vm633_vm2 = vcmask 261120  }
  0x17   : > { %431 = vmatpush.msra.mxu0 %v314_v1  ;;  %s1531_s17 = sshll.u32 %s2305_s16, 3  ;;  %742 = vmatpush.msra.mxu1 %v628_v14  ;;  %v626_v17 = vld [vmem:[%s2291_s3 + $0x8] sm:$0xff]  ;;  %v625_v18 = vld [vmem:[%s2291_s3] sm:$0xff]  ;;  %s2246_s16 = sshll.u32 %s272_s15, 1 }
  0x18   : > { %s1886_s20 = scalar_lea.vmem %s2288_s0, %s1531_s17  ;;  %v1935_v22 = vld [vmem:[%s2290_s2] ss:$0 sm:$0xff]  ;;  %s1668_s17 = sshll.u32 %s1852_s6, 1 }
  0x19   : > { %v282_v2 = vld [vmem:[%s1886_s20] sm:$0xff]  ;;  %v283_v3 = vld [vmem:[%s1886_s20 + $0x8] sm:$0xff]  ;;  %v284_v4 = vld [vmem:[%s1886_s20 + $0x10] sm:$0xff]  ;;  %743 = vmatpush.msra.mxu1 %v627_v16  ;;  %s1461_s21 = scalar_lea.hbm %s2295_s7, %s1668_s17  ;;  %s274_s6 = scalar_lea.vmem [#allocation3], %s2246_s16 }
  0x1a   : > { %1532 = vmatmul.msk.f32.vlgmr.msra.gmra.mxu0 %vm319_vm0, %v282_v2  ;;  %v285_v5 = vld [vmem:[%s1886_s20 + $0x18] sm:$0xff]  ;;  %v286_v6 = vld [vmem:[%s1886_s20 + $0x20] sm:$0xff]  ;;  %v287_v7 = vld [vmem:[%s1886_s20 + $0x28] sm:$0xff]  ;;  %s1463_s22 = sshll.u32 %s274_s6, 4  ;;  %s1465_s23 = sshll.u32 %s1461_s21, 4  ;;  %s1464_s22 = int_to_ptr.vmem [resolvable:$true] %s1463_s22  ;;  %s1466_s23 = int_to_ptr.hbm [resolvable:$true] %s1465_s23 }
  0x1b   : > { %v288_v8 = vld [vmem:[%s1886_s20 + $0x30] sm:$0xff]  ;;  %v289_v9 = vld [vmem:[%s1886_s20 + $0x38] sm:$0xff]  ;;  %v290_v10 = vld [vmem:[%s1886_s20 + $0x40] sm:$0xff]  ;;  %744 = vmatpush.msra.mxu1 %v626_v17  ;;  %s1737_s25 = sshra.s32 %s1466_s23, 4  ;;  %s1738_s25 = int_to_ptr.hbm [resolvable:$true] %s1737_s25 }
  0x1c   : > { %v291_v11 = vld [vmem:[%s1886_s20 + $0x48] sm:$0xff]  ;;  %v292_v12 = vld [vmem:[%s1886_s20 + $0x50] sm:$0xff]  ;;  %v293_v13 = vld [vmem:[%s1886_s20 + $0x58] sm:$0xff]  ;;  %s1739_s30 = scalar_lea.hbm %s1738_s25, 2  ;;  %p1744_p0 = scmp.lt.s32.totalorder %s1738_s25, %s2295_s7 }
  0x1d   : > { %v294_v15 = vld [vmem:[%s1886_s20 + $0x60] sm:$0xff]  ;;  %745 = vmatpush.msra.mxu1 %v625_v18  ;;  %v295_v19 = vld [vmem:[%s1886_s20 + $0x68] sm:$0xff]  ;;  %v296_v20 = vld [vmem:[%s1886_s20 + $0x70] sm:$0xff]  ;;  %p1740_p11 = scmp.ne.s32.totalorder %s1738_s25, %s1739_s30  ;;  %p1745_p1 = scmp.lt.s32.totalorder %s1743_s10, %s1739_s30 }
  0x1e   : > { %v297_v21 = vld [vmem:[%s1886_s20 + $0x78] sm:$0xff]  ;;  %v298_v24 = vld [vmem:[%s1886_s20 + $0x80] sm:$0xff]  ;;  %v299_v29 = vld [vmem:[%s1886_s20 + $0x88] sm:$0xff] }
  0x1f   : > { %v300_v34 = vld [vmem:[%s1886_s20 + $0x90] sm:$0xff]  ;;  %v301_v39 = vld [vmem:[%s1886_s20 + $0x98] sm:$0xff]  ;;  %v302_v44 = vld [vmem:[%s1886_s20 + $0xa0] sm:$0xff]  ;;  %p1741_p12 = pnand %p1740_p11, %p1869_p5  ;;  %p1746_p2 = por %p1745_p1, %p1744_p0 }
  0x20   : > { %v303_v49 = vld [vmem:[%s1886_s20 + $0xa8] sm:$0xff]  ;;  %v304_v54 = vld [vmem:[%s1886_s20 + $0xb0] sm:$0xff]  ;;  %v305_v59 = vld [vmem:[%s1886_s20 + $0xb8] sm:$0xff] }
  0x21   : > { %v306_v0 = vld [vmem:[%s1886_s20 + $0xc0] sm:$0xff]  ;;  %p1742_p13 = pneg %p1741_p12 }
  0x22   : > { %1533 = vmatmul.msk.f32.gmra.mxu0 %vm319_vm0, %v283_v3 }
  0x23   : > { %p1747_p3 = pnand %p1746_p2, %p1742_p13 }
  0x2a   : > { %1534 = vmatmul.msk.f32.gmra.mxu0 %vm319_vm0, %v284_v4 }
  0x32   : > { %1535 = vmatmul.msk.f32.gmra.mxu0 %vm319_vm0, %v285_v5  ;;  %v307_v5 = vld [vmem:[%s1886_s20 + $0xc8] sm:$0xff] }
  0x3a   : > { %1536 = vmatmul.msk.f32.gmra.mxu0 %vm319_vm0, %v286_v6 }
  0x42   : > { %1537 = vmatmul.msk.f32.gmra.mxu0 %vm319_vm0, %v287_v7 }
  0x4a   : > { %1538 = vmatmul.msk.f32.gmra.mxu0 %vm319_vm0, %v288_v8 }
  0x52   : > { %1539 = vmatmul.msk.f32.gmra.mxu0 %vm319_vm0, %v289_v9 }
  0x5a   : > { %1540 = vmatmul.msk.f32.gmra.mxu0 %vm319_vm0, %v290_v10  ;;  %v308_v10 = vld [vmem:[%s1886_s20 + $0xd0] sm:$0xff] }
  0x62   : > { %1541 = vmatmul.msk.f32.gmra.mxu0 %vm319_vm0, %v291_v11 }
  0x6a   : > { %1542 = vmatmul.msk.f32.gmra.mxu0 %vm319_vm0, %v292_v12 }
  0x72   : > { %1543 = vmatmul.msk.f32.gmra.mxu0 %vm319_vm0, %v293_v13 }
  0x7a   : > { %1544 = vmatmul.msk.f32.gmra.mxu0 %vm319_vm0, %v294_v15  ;;  %v309_v15 = vld [vmem:[%s1886_s20 + $0xd8] sm:$0xff] }
  0x82   : > { %1545 = vmatmul.msk.f32.gmra.mxu0 %vm319_vm0, %v295_v19 }
  0x8a   : > { %1546 = vmatmul.msk.f32.gmra.mxu0 %vm319_vm0, %v296_v20  ;;  %v310_v20 = vld [vmem:[%s1886_s20 + $0xe0] sm:$0xff] }
  0x92   : > { %1547 = vmatmul.msk.f32.gmra.mxu0 %vm319_vm0, %v297_v21 }
  0x97   : > { %v433_v23 = vpop.f32.mrf.mxu0 }
  0x98   : > { %v434_v25 = vadd.f32 %v1935_v22, %v433_v23  ;;  %v1599_v23 = vld [vmem:[%s2291_s3 + $0x38] sm:$0xff] }
  0x99   : > { %1057 = vmatpush.msra.mxu2 %v1599_v23 }
  0x9a   : > { %1548 = vmatmul.msk.f32.gmra.mxu0 %vm319_vm0, %v298_v24  ;;  %vm529_vm1 = vcmp.gt.f32.partialorder %v434_v25, 0.0  ;;  %v561_v26 = vmul.f32 0.01, %v434_v25 }
  0x9c   : > { %v593_v27 = vsel %vm529_vm1, %v434_v25, %v561_v26  ;;  %v1598_v25 = vld [vmem:[%s2291_s3 + $0x30] sm:$0xff] }
  0x9d   : > { %1564 = vmatmul.msk.f32.vlgmr.msra.gmra.mxu1 %vm633_vm2, %v593_v27  ;;  %1058 = vmatpush.msra.mxu2 %v1598_v25  ;;  %v1597_v27 = vld [vmem:[%s2291_s3 + $0x28] sm:$0xff] }
  0x9f   : > { %v436_v28 = vpop.f32.mrf.mxu0  ;;  %1059 = vmatpush.msra.mxu2 %v1597_v27 }
  0xa0   : > { %v437_v30 = vadd.f32 %v1935_v22, %v436_v28  ;;  %v1596_v28 = vld [vmem:[%s2291_s3 + $0x20] sm:$0xff] }
  0xa1   : > { %1060 = vmatpush.msra.mxu2 %v1596_v28 }
  0xa2   : > { %1549 = vmatmul.msk.f32.gmra.mxu0 %vm319_vm0, %v299_v29  ;;  %vm530_vm3 = vcmp.gt.f32.partialorder %v437_v30, 0.0  ;;  %v562_v31 = vmul.f32 0.01, %v437_v30 }
  0xa4   : > { %v594_v32 = vsel %vm530_vm3, %v437_v30, %v562_v31  ;;  %v311_v30 = vld [vmem:[%s1886_s20 + $0xe8] sm:$0xff] }
  0xa5   : > { %1565 = vmatmul.msk.f32.gmra.mxu1 %vm633_vm2, %v594_v32 }
  0xa7   : > { %v439_v33 = vpop.f32.mrf.mxu0 }
  0xa8   : > { %v440_v35 = vadd.f32 %v1935_v22, %v439_v33 }
  0xaa   : > { %1550 = vmatmul.msk.f32.gmra.mxu0 %vm319_vm0, %v300_v34  ;;  %vm531_vm4 = vcmp.gt.f32.partialorder %v440_v35, 0.0  ;;  %v563_v36 = vmul.f32 0.01, %v440_v35 }
  0xac   : > { %v595_v37 = vsel %vm531_vm4, %v440_v35, %v563_v36  ;;  %v312_v35 = vld [vmem:[%s1886_s20 + $0xf0] sm:$0xff] }
  0xad   : > { %1566 = vmatmul.msk.f32.gmra.mxu1 %vm633_vm2, %v595_v37 }
  0xaf   : > { %v442_v38 = vpop.f32.mrf.mxu0 }
  0xb0   : > { %v443_v40 = vadd.f32 %v1935_v22, %v442_v38 }
  0xb2   : > { %1551 = vmatmul.msk.f32.gmra.mxu0 %vm319_vm0, %v301_v39  ;;  %vm532_vm5 = vcmp.gt.f32.partialorder %v443_v40, 0.0  ;;  %v564_v41 = vmul.f32 0.01, %v443_v40 }
  0xb4   : > { %v596_v42 = vsel %vm532_vm5, %v443_v40, %v564_v41  ;;  %v313_v40 = vld [vmem:[%s1886_s20 + $0xf8] sm:$0xff] }
  0xb5   : > { %1567 = vmatmul.msk.f32.gmra.mxu1 %vm633_vm2, %v596_v42 }
  0xb7   : > { %v445_v43 = vpop.f32.mrf.mxu0 }
  0xb8   : > { %v446_v45 = vadd.f32 %v1935_v22, %v445_v43 }
  0xba   : > { %1552 = vmatmul.msk.f32.gmra.mxu0 %vm319_vm0, %v302_v44  ;;  %vm533_vm6 = vcmp.gt.f32.partialorder %v446_v45, 0.0  ;;  %v565_v46 = vmul.f32 0.01, %v446_v45 }
  0xbc   : > { %v597_v47 = vsel %vm533_vm6, %v446_v45, %v565_v46  ;;  %v2016_v45 = vld [vmem:[%s2292_s4] ss:$0 sm:$0xff] }
  0xbd   : > { %1568 = vmatmul.msk.f32.gmra.mxu1 %vm633_vm2, %v597_v47 }
  0xbf   : > { %v448_v48 = vpop.f32.mrf.mxu0 }
  0xc0   : > { %v449_v50 = vadd.f32 %v1935_v22, %v448_v48 }
  0xc2   : > { %1553 = vmatmul.msk.f32.gmra.mxu0 %vm319_vm0, %v303_v49  ;;  %vm534_vm7 = vcmp.gt.f32.partialorder %v449_v50, 0.0  ;;  %v566_v51 = vmul.f32 0.01, %v449_v50 }
  0xc4   : > { %v598_v52 = vsel %vm534_vm7, %v449_v50, %v566_v51 }
  0xc5   : > { %1569 = vmatmul.msk.f32.gmra.mxu1 %vm633_vm2, %v598_v52 }
  0xc7   : > { %v451_v53 = vpop.f32.mrf.mxu0 }
  0xc8   : > { %v452_v55 = vadd.f32 %v1935_v22, %v451_v53 }
  0xca   : > { %1554 = vmatmul.msk.f32.gmra.mxu0 %vm319_vm0, %v304_v54  ;;  %vm535_vm8 = vcmp.gt.f32.partialorder %v452_v55, 0.0  ;;  %v567_v56 = vmul.f32 0.01, %v452_v55 }
  0xcc   : > { %v599_v57 = vsel %vm535_vm8, %v452_v55, %v567_v56 }
  0xcd   : > { %1570 = vmatmul.msk.f32.gmra.mxu1 %vm633_vm2, %v599_v57 }
  0xcf   : > { %v454_v58 = vpop.f32.mrf.mxu0 }
  0xd0   : > { %v455_v60 = vadd.f32 %v1935_v22, %v454_v58 }
  0xd2   : > { %1555 = vmatmul.msk.f32.gmra.mxu0 %vm319_vm0, %v305_v59  ;;  %vm536_vm9 = vcmp.gt.f32.partialorder %v455_v60, 0.0  ;;  %v568_v61 = vmul.f32 0.01, %v455_v60 }
  0xd4   : > { %v600_v62 = vsel %vm536_vm9, %v455_v60, %v568_v61 }
  0xd5   : > { %1571 = vmatmul.msk.f32.gmra.mxu1 %vm633_vm2, %v600_v62 }
  0xd7   : > { %v457_v63 = vpop.f32.mrf.mxu0 }
  0xd8   : > { %v458_v1 = vadd.f32 %v1935_v22, %v457_v63 }
  0xda   : > { %v569_v2 = vmul.f32 0.01, %v458_v1  ;;  %1556 = vmatmul.msk.f32.gmra.mxu0 %vm319_vm0, %v306_v0  ;;  %vm537_vm10 = vcmp.gt.f32.partialorder %v458_v1, 0.0 }
  0xdc   : > { %v601_v3 = vsel %vm537_vm10, %v458_v1, %v569_v2 }
  0xdd   : > { %1572 = vmatmul.msk.f32.gmra.mxu1 %vm633_vm2, %v601_v3 }
  0xdf   : > { %v460_v4 = vpop.f32.mrf.mxu0 }
  0xe0   : > { %v461_v6 = vadd.f32 %v1935_v22, %v460_v4 }
  0xe2   : > { %v570_v7 = vmul.f32 0.01, %v461_v6  ;;  %1557 = vmatmul.msk.f32.gmra.mxu0 %vm319_vm0, %v307_v5  ;;  %vm538_vm11 = vcmp.gt.f32.partialorder %v461_v6, 0.0 }
  0xe4   : > { %v602_v8 = vsel %vm538_vm11, %v461_v6, %v570_v7 }
  0xe5   : > { %1573 = vmatmul.msk.f32.gmra.mxu1 %vm633_vm2, %v602_v8 }
  0xe7   : > { %v463_v9 = vpop.f32.mrf.mxu0 }
  0xe8   : > { %v464_v11 = vadd.f32 %v1935_v22, %v463_v9 }
  0xea   : > { %v571_v12 = vmul.f32 0.01, %v464_v11  ;;  %1558 = vmatmul.msk.f32.gmra.mxu0 %vm319_vm0, %v308_v10  ;;  %vm539_vm12 = vcmp.gt.f32.partialorder %v464_v11, 0.0 }
  0xec   : > { %v603_v13 = vsel %vm539_vm12, %v464_v11, %v571_v12 }
  0xed   : > { %1574 = vmatmul.msk.f32.gmra.mxu1 %vm633_vm2, %v603_v13 }
  0xef   : > { %v466_v14 = vpop.f32.mrf.mxu0 }
  0xf0   : > { %v467_v16 = vadd.f32 %v1935_v22, %v466_v14 }
  0xf2   : > { %v572_v17 = vmul.f32 0.01, %v467_v16  ;;  %1559 = vmatmul.msk.f32.gmra.mxu0 %vm319_vm0, %v309_v15  ;;  %vm540_vm13 = vcmp.gt.f32.partialorder %v467_v16, 0.0 }
  0xf4   : > { %v604_v18 = vsel %vm540_vm13, %v467_v16, %v572_v17 }
  0xf5   : > { %1575 = vmatmul.msk.f32.gmra.mxu1 %vm633_vm2, %v604_v18 }
  0xf7   : > { %v469_v19 = vpop.f32.mrf.mxu0 }
  0xf8   : > { %v470_v21 = vadd.f32 %v1935_v22, %v469_v19 }
  0xfa   : > { %v573_v24 = vmul.f32 0.01, %v470_v21  ;;  %1560 = vmatmul.msk.f32.gmra.mxu0 %vm319_vm0, %v310_v20  ;;  %vm541_vm14 = vcmp.gt.f32.partialorder %v470_v21, 0.0 }
  0xfc   : > { %v605_v26 = vsel %vm541_vm14, %v470_v21, %v573_v24 }
  0xfd   : > { %1576 = vmatmul.msk.f32.gmra.mxu1 %vm633_vm2, %v605_v26 }
  0xff   : > { %v472_v29 = vpop.f32.mrf.mxu0 }
 0x100   : > { %v473_v31 = vadd.f32 %v1935_v22, %v472_v29 }
 0x102   : > { %v574_v32 = vmul.f32 0.01, %v473_v31  ;;  %1561 = vmatmul.msk.f32.gmra.mxu0 %vm319_vm0, %v311_v30  ;;  %vm542_vm15 = vcmp.gt.f32.partialorder %v473_v31, 0.0 }
 0x104   : > { %v606_v33 = vsel %vm542_vm15, %v473_v31, %v574_v32 }
 0x105   : > { %1577 = vmatmul.msk.f32.gmra.mxu1 %vm633_vm2, %v606_v33 }
 0x107   : > { %v475_v34 = vpop.f32.mrf.mxu0 }
 0x108   : > { %v476_v36 = vadd.f32 %v1935_v22, %v475_v34 }
 0x10a   : > { %v575_v37 = vmul.f32 0.01, %v476_v36  ;;  %1562 = vmatmul.msk.f32.gmra.mxu0 %vm319_vm0, %v312_v35  ;;  %vm543_vm1 = vcmp.gt.f32.partialorder %v476_v36, 0.0 }
 0x10c   : > { %v607_v38 = vsel %vm543_vm1, %v476_v36, %v575_v37 }
 0x10d   : > { %1578 = vmatmul.msk.f32.gmra.mxu1 %vm633_vm2, %v607_v38 }
 0x10f   : > { %v478_v39 = vpop.f32.mrf.mxu0 }
 0x110   : > { %v479_v41 = vadd.f32 %v1935_v22, %v478_v39 }
 0x112   : > { %v576_v42 = vmul.f32 0.01, %v479_v41  ;;  %1563 = vmatmul.msk.f32.gmra.mxu0 %vm319_vm0, %v313_v40  ;;  %vm544_vm3 = vcmp.gt.f32.partialorder %v479_v41, 0.0 }
 0x114   : > { %v608_v43 = vsel %vm544_vm3, %v479_v41, %v576_v42 }
 0x115   : > { %1579 = vmatmul.msk.f32.gmra.mxu1 %vm633_vm2, %v608_v43 }
 0x117   : > { %v481_v44 = vpop.f32.mrf.mxu0 }
 0x118   : > { %v482_v46 = vadd.f32 %v1935_v22, %v481_v44 }
 0x11a   : > { %v577_v47 = vmul.f32 0.01, %v482_v46  ;;  %v747_v48 = vpop.f32.mrf.mxu1  ;;  %vm545_vm4 = vcmp.gt.f32.partialorder %v482_v46, 0.0 }
 0x11b   : > { %v748_v49 = vadd.f32 %v2016_v45, %v747_v48 }
 0x11c   : > { %v609_v50 = vsel %vm545_vm4, %v482_v46, %v577_v47 }
 0x11d   : > { %1580 = vmatmul.msk.f32.gmra.mxu1 %vm633_vm2, %v609_v50  ;;  %vm843_vm0 = vcmp.gt.f32.partialorder %v748_v49, 0.0  ;;  %v875_v51 = vmul.f32 0.01, %v748_v49 }
 0x11f   : > { %v484_v52 = vpop.f32.mrf.mxu0  ;;  %v907_v53 = vsel %vm843_vm0, %v748_v49, %v875_v51 }
 0x120   : > { %v485_v54 = vadd.f32 %v1935_v22, %v484_v52  ;;  %1601 = vmatmul.msk.f32.vlgmr.msra.gmra.mxu2 %vm633_vm2, %v907_v53 }
 0x122   : > { %v578_v55 = vmul.f32 0.01, %v485_v54  ;;  %v750_v56 = vpop.f32.mrf.mxu1  ;;  %vm546_vm5 = vcmp.gt.f32.partialorder %v485_v54, 0.0 }
 0x123   : > { %v751_v57 = vadd.f32 %v2016_v45, %v750_v56 }
 0x124   : > { %v610_v58 = vsel %vm546_vm5, %v485_v54, %v578_v55 }
 0x125   : > { %1581 = vmatmul.msk.f32.gmra.mxu1 %vm633_vm2, %v610_v58  ;;  %vm844_vm6 = vcmp.gt.f32.partialorder %v751_v57, 0.0  ;;  %v876_v59 = vmul.f32 0.01, %v751_v57 }
 0x127   : > { %v487_v60 = vpop.f32.mrf.mxu0  ;;  %v908_v61 = vsel %vm844_vm6, %v751_v57, %v876_v59 }
 0x128   : > { %v488_v62 = vadd.f32 %v1935_v22, %v487_v60  ;;  %1602 = vmatmul.msk.f32.gmra.mxu2 %vm633_vm2, %v908_v61 }
 0x12a   : > { %v579_v63 = vmul.f32 0.01, %v488_v62  ;;  %v753_v0 = vpop.f32.mrf.mxu1  ;;  %vm547_vm7 = vcmp.gt.f32.partialorder %v488_v62, 0.0 }
 0x12b   : > { %v754_v1 = vadd.f32 %v2016_v45, %v753_v0 }
 0x12c   : > { %v611_v2 = vsel %vm547_vm7, %v488_v62, %v579_v63 }
 0x12d   : > { %1582 = vmatmul.msk.f32.gmra.mxu1 %vm633_vm2, %v611_v2  ;;  %vm845_vm8 = vcmp.gt.f32.partialorder %v754_v1, 0.0  ;;  %v877_v3 = vmul.f32 0.01, %v754_v1 }
 0x12f   : > { %v490_v4 = vpop.f32.mrf.mxu0  ;;  %v909_v5 = vsel %vm845_vm8, %v754_v1, %v877_v3 }
 0x130   : > { %v491_v6 = vadd.f32 %v1935_v22, %v490_v4  ;;  %1603 = vmatmul.msk.f32.gmra.mxu2 %vm633_vm2, %v909_v5 }
 0x132   : > { %v580_v7 = vmul.f32 0.01, %v491_v6  ;;  %v756_v8 = vpop.f32.mrf.mxu1  ;;  %vm548_vm9 = vcmp.gt.f32.partialorder %v491_v6, 0.0 }
 0x133   : > { %v757_v9 = vadd.f32 %v2016_v45, %v756_v8 }
 0x134   : > { %v612_v10 = vsel %vm548_vm9, %v491_v6, %v580_v7 }
 0x135   : > { %1583 = vmatmul.msk.f32.gmra.mxu1 %vm633_vm2, %v612_v10  ;;  %vm846_vm10 = vcmp.gt.f32.partialorder %v757_v9, 0.0  ;;  %v878_v11 = vmul.f32 0.01, %v757_v9 }
 0x137   : > { %v493_v12 = vpop.f32.mrf.mxu0  ;;  %v910_v13 = vsel %vm846_vm10, %v757_v9, %v878_v11 }
 0x138   : > { %v494_v14 = vadd.f32 %v1935_v22, %v493_v12  ;;  %1604 = vmatmul.msk.f32.gmra.mxu2 %vm633_vm2, %v910_v13 }
 0x13a   : > { %v581_v15 = vmul.f32 0.01, %v494_v14  ;;  %v759_v16 = vpop.f32.mrf.mxu1  ;;  %vm549_vm11 = vcmp.gt.f32.partialorder %v494_v14, 0.0 }
 0x13b   : > { %v760_v17 = vadd.f32 %v2016_v45, %v759_v16 }
 0x13c   : > { %v613_v18 = vsel %vm549_vm11, %v494_v14, %v581_v15 }
 0x13d   : > { %1584 = vmatmul.msk.f32.gmra.mxu1 %vm633_vm2, %v613_v18  ;;  %vm847_vm12 = vcmp.gt.f32.partialorder %v760_v17, 0.0  ;;  %v879_v19 = vmul.f32 0.01, %v760_v17 }
 0x13f   : > { %v496_v20 = vpop.f32.mrf.mxu0  ;;  %v911_v21 = vsel %vm847_vm12, %v760_v17, %v879_v19 }
 0x140   : > { %v497_v23 = vadd.f32 %v1935_v22, %v496_v20  ;;  %1605 = vmatmul.msk.f32.gmra.mxu2 %vm633_vm2, %v911_v21 }
 0x142   : > { %v582_v24 = vmul.f32 0.01, %v497_v23  ;;  %v762_v25 = vpop.f32.mrf.mxu1  ;;  %vm550_vm13 = vcmp.gt.f32.partialorder %v497_v23, 0.0 }
 0x143   : > { %v763_v26 = vadd.f32 %v2016_v45, %v762_v25 }
 0x144   : > { %v614_v27 = vsel %vm550_vm13, %v497_v23, %v582_v24 }
 0x145   : > { %1585 = vmatmul.msk.f32.gmra.mxu1 %vm633_vm2, %v614_v27  ;;  %vm848_vm14 = vcmp.gt.f32.partialorder %v763_v26, 0.0  ;;  %v880_v28 = vmul.f32 0.01, %v763_v26 }
 0x147   : > { %v499_v29 = vpop.f32.mrf.mxu0  ;;  %v912_v30 = vsel %vm848_vm14, %v763_v26, %v880_v28 }
 0x148   : > { %v500_v31 = vadd.f32 %v1935_v22, %v499_v29  ;;  %1606 = vmatmul.msk.f32.gmra.mxu2 %vm633_vm2, %v912_v30 }
 0x14a   : > { %v583_v32 = vmul.f32 0.01, %v500_v31  ;;  %v765_v33 = vpop.f32.mrf.mxu1  ;;  %vm551_vm15 = vcmp.gt.f32.partialorder %v500_v31, 0.0 }
 0x14b   : > { %v766_v34 = vadd.f32 %v2016_v45, %v765_v33 }
 0x14c   : > { %v615_v35 = vsel %vm551_vm15, %v500_v31, %v583_v32 }
 0x14d   : > { %1586 = vmatmul.msk.f32.gmra.mxu1 %vm633_vm2, %v615_v35  ;;  %vm849_vm1 = vcmp.gt.f32.partialorder %v766_v34, 0.0  ;;  %v881_v36 = vmul.f32 0.01, %v766_v34 }
 0x14f   : > { %v502_v37 = vpop.f32.mrf.mxu0  ;;  %v913_v38 = vsel %vm849_vm1, %v766_v34, %v881_v36 }
 0x150   : > { %v503_v39 = vadd.f32 %v1935_v22, %v502_v37  ;;  %1607 = vmatmul.msk.f32.gmra.mxu2 %vm633_vm2, %v913_v38 }
 0x152   : > { %v584_v40 = vmul.f32 0.01, %v503_v39  ;;  %v768_v41 = vpop.f32.mrf.mxu1  ;;  %vm552_vm3 = vcmp.gt.f32.partialorder %v503_v39, 0.0 }
 0x153   : > { %v769_v42 = vadd.f32 %v2016_v45, %v768_v41 }
 0x154   : > { %v616_v43 = vsel %vm552_vm3, %v503_v39, %v584_v40 }
 0x155   : > { %1587 = vmatmul.msk.f32.gmra.mxu1 %vm633_vm2, %v616_v43  ;;  %vm850_vm4 = vcmp.gt.f32.partialorder %v769_v42, 0.0  ;;  %v882_v44 = vmul.f32 0.01, %v769_v42 }
 0x157   : > { %v505_v46 = vpop.f32.mrf.mxu0  ;;  %v914_v47 = vsel %vm850_vm4, %v769_v42, %v882_v44 }
 0x158   : > { %v506_v48 = vadd.f32 %v1935_v22, %v505_v46  ;;  %1608 = vmatmul.msk.f32.gmra.mxu2 %vm633_vm2, %v914_v47 }
 0x15a   : > { %vm553_vm0 = vcmp.gt.f32.partialorder %v506_v48, 0.0  ;;  %v585_v49 = vmul.f32 0.01, %v506_v48  ;;  %v771_v50 = vpop.f32.mrf.mxu1 }
 0x15b   : > { %v772_v51 = vadd.f32 %v2016_v45, %v771_v50 }
 0x15c   : > { %v617_v52 = vsel %vm553_vm0, %v506_v48, %v585_v49 }
 0x15d   : > { %v883_v53 = vmul.f32 0.01, %v772_v51  ;;  %1588 = vmatmul.msk.f32.gmra.mxu1 %vm633_vm2, %v617_v52  ;;  %vm851_vm5 = vcmp.gt.f32.partialorder %v772_v51, 0.0 }
 0x15f   : > { %v508_v54 = vpop.f32.mrf.mxu0  ;;  %v915_v55 = vsel %vm851_vm5, %v772_v51, %v883_v53 }
 0x160   : > { %v509_v56 = vadd.f32 %v1935_v22, %v508_v54  ;;  %1609 = vmatmul.msk.f32.gmra.mxu2 %vm633_vm2, %v915_v55 }
 0x162   : > { %vm554_vm6 = vcmp.gt.f32.partialorder %v509_v56, 0.0  ;;  %v586_v57 = vmul.f32 0.01, %v509_v56  ;;  %v774_v58 = vpop.f32.mrf.mxu1 }
 0x163   : > { %v775_v59 = vadd.f32 %v2016_v45, %v774_v58 }
 0x164   : > { %v618_v60 = vsel %vm554_vm6, %v509_v56, %v586_v57 }
 0x165   : > { %v884_v61 = vmul.f32 0.01, %v775_v59  ;;  %1589 = vmatmul.msk.f32.gmra.mxu1 %vm633_vm2, %v618_v60  ;;  %vm852_vm7 = vcmp.gt.f32.partialorder %v775_v59, 0.0 }
 0x167   : > { %v511_v62 = vpop.f32.mrf.mxu0  ;;  %v916_v63 = vsel %vm852_vm7, %v775_v59, %v884_v61 }
 0x168   : > { %v512_v0 = vadd.f32 %v1935_v22, %v511_v62  ;;  %1610 = vmatmul.msk.f32.gmra.mxu2 %vm633_vm2, %v916_v63 }
 0x16a   : > { %vm555_vm8 = vcmp.gt.f32.partialorder %v512_v0, 0.0  ;;  %v587_v1 = vmul.f32 0.01, %v512_v0  ;;  %v777_v2 = vpop.f32.mrf.mxu1 }
 0x16b   : > { %v778_v3 = vadd.f32 %v2016_v45, %v777_v2 }
 0x16c   : > { %v619_v4 = vsel %vm555_vm8, %v512_v0, %v587_v1 }
 0x16d   : > { %v885_v5 = vmul.f32 0.01, %v778_v3  ;;  %1590 = vmatmul.msk.f32.gmra.mxu1 %vm633_vm2, %v619_v4  ;;  %vm853_vm9 = vcmp.gt.f32.partialorder %v778_v3, 0.0 }
 0x16f   : > { %v514_v6 = vpop.f32.mrf.mxu0  ;;  %v917_v7 = vsel %vm853_vm9, %v778_v3, %v885_v5 }
 0x170   : > { %v515_v8 = vadd.f32 %v1935_v22, %v514_v6  ;;  %1611 = vmatmul.msk.f32.gmra.mxu2 %vm633_vm2, %v917_v7 }
 0x172   : > { %vm556_vm10 = vcmp.gt.f32.partialorder %v515_v8, 0.0  ;;  %v588_v9 = vmul.f32 0.01, %v515_v8  ;;  %v780_v10 = vpop.f32.mrf.mxu1 }
 0x173   : > { %v781_v11 = vadd.f32 %v2016_v45, %v780_v10 }
 0x174   : > { %v620_v12 = vsel %vm556_vm10, %v515_v8, %v588_v9 }
 0x175   : > { %v886_v13 = vmul.f32 0.01, %v781_v11  ;;  %1591 = vmatmul.msk.f32.gmra.mxu1 %vm633_vm2, %v620_v12  ;;  %vm854_vm11 = vcmp.gt.f32.partialorder %v781_v11, 0.0 }
 0x177   : > { %v517_v14 = vpop.f32.mrf.mxu0  ;;  %v918_v15 = vsel %vm854_vm11, %v781_v11, %v886_v13 }
 0x178   : > { %v518_v16 = vadd.f32 %v1935_v22, %v517_v14  ;;  %1612 = vmatmul.msk.f32.gmra.mxu2 %vm633_vm2, %v918_v15 }
 0x17a   : > { %vm557_vm12 = vcmp.gt.f32.partialorder %v518_v16, 0.0  ;;  %v589_v17 = vmul.f32 0.01, %v518_v16  ;;  %v783_v18 = vpop.f32.mrf.mxu1 }
 0x17b   : > { %v784_v19 = vadd.f32 %v2016_v45, %v783_v18 }
 0x17c   : > { %v621_v20 = vsel %vm557_vm12, %v518_v16, %v589_v17 }
 0x17d   : > { %v887_v21 = vmul.f32 0.01, %v784_v19  ;;  %1592 = vmatmul.msk.f32.gmra.mxu1 %vm633_vm2, %v621_v20  ;;  %vm855_vm13 = vcmp.gt.f32.partialorder %v784_v19, 0.0 }
 0x17f   : > { %v520_v23 = vpop.f32.mrf.mxu0  ;;  %v919_v24 = vsel %vm855_vm13, %v784_v19, %v887_v21 }
 0x180   : > { %v521_v25 = vadd.f32 %v1935_v22, %v520_v23  ;;  %1613 = vmatmul.msk.f32.gmra.mxu2 %vm633_vm2, %v919_v24 }
 0x182   : > { %vm558_vm14 = vcmp.gt.f32.partialorder %v521_v25, 0.0  ;;  %v590_v26 = vmul.f32 0.01, %v521_v25  ;;  %v786_v27 = vpop.f32.mrf.mxu1 }
 0x183   : > { %v787_v28 = vadd.f32 %v2016_v45, %v786_v27 }
 0x184   : > { %v622_v29 = vsel %vm558_vm14, %v521_v25, %v590_v26 }
 0x185   : > { %v888_v30 = vmul.f32 0.01, %v787_v28  ;;  %1593 = vmatmul.msk.f32.gmra.mxu1 %vm633_vm2, %v622_v29  ;;  %vm856_vm15 = vcmp.gt.f32.partialorder %v787_v28, 0.0 }
 0x187   : > { %v523_v31 = vpop.f32.mrf.mxu0  ;;  %v920_v32 = vsel %vm856_vm15, %v787_v28, %v888_v30 }
 0x188   : > { %v524_v33 = vadd.f32 %v1935_v22, %v523_v31  ;;  %1614 = vmatmul.msk.f32.gmra.mxu2 %vm633_vm2, %v920_v32 }
 0x18a   : > { %vm559_vm1 = vcmp.gt.f32.partialorder %v524_v33, 0.0  ;;  %v591_v34 = vmul.f32 0.01, %v524_v33  ;;  %v789_v35 = vpop.f32.mrf.mxu1 }
 0x18b   : > { %v790_v36 = vadd.f32 %v2016_v45, %v789_v35 }
 0x18c   : > { %v623_v37 = vsel %vm559_vm1, %v524_v33, %v591_v34 }
 0x18d   : > { %v889_v38 = vmul.f32 0.01, %v790_v36  ;;  %1594 = vmatmul.msk.f32.gmra.mxu1 %vm633_vm2, %v623_v37  ;;  %vm857_vm3 = vcmp.gt.f32.partialorder %v790_v36, 0.0 }
 0x18f   : > { %v526_v39 = vpop.f32.mrf.mxu0  ;;  %v921_v40 = vsel %vm857_vm3, %v790_v36, %v889_v38 }
 0x190   : > { %v527_v41 = vadd.f32 %v1935_v22, %v526_v39  ;;  %1615 = vmatmul.msk.f32.gmra.mxu2 %vm633_vm2, %v921_v40 }
 0x192   : > { %vm560_vm4 = vcmp.gt.f32.partialorder %v527_v41, 0.0  ;;  %v592_v42 = vmul.f32 0.01, %v527_v41  ;;  %v792_v43 = vpop.f32.mrf.mxu1 }
 0x193   : > { %v793_v44 = vadd.f32 %v2016_v45, %v792_v43 }
 0x194   : > { %v624_v46 = vsel %vm560_vm4, %v527_v41, %v592_v42 }
 0x195   : > { %v890_v47 = vmul.f32 0.01, %v793_v44  ;;  %1595 = vmatmul.msk.f32.gmra.mxu1 %vm633_vm2, %v624_v46  ;;  %vm858_vm0 = vcmp.gt.f32.partialorder %v793_v44, 0.0 }
 0x197   : > { %v922_v48 = vsel %vm858_vm0, %v793_v44, %v890_v47 }
 0x198   : > { %1616 = vmatmul.msk.f32.gmra.mxu2 %vm633_vm2, %v922_v48 }
 0x19a   : > { %v795_v49 = vpop.f32.mrf.mxu1 }
 0x19b   : > { %v796_v50 = vadd.f32 %v2016_v45, %v795_v49 }
 0x19d   : > { %v891_v51 = vmul.f32 0.01, %v796_v50  ;;  %vm859_vm5 = vcmp.gt.f32.partialorder %v796_v50, 0.0 }
 0x19f   : > { %v923_v22 = vsel %vm859_vm5, %v796_v50, %v891_v51 }
 0x1a0   : > { %1617 = vmatmul.msk.f32.gmra.mxu2 %vm633_vm2, %v923_v22 }
 0x1a2   : > { %v798_v52 = vpop.f32.mrf.mxu1 }
 0x1a3   : > { %v799_v53 = vadd.f32 %v2016_v45, %v798_v52  ;;  %v2085_v54 = vpop.f32.mrf.mxu2 }
 0x1a5   : > { %v892_v55 = vmul.f32 0.01, %v799_v53  ;;  %vm860_vm6 = vcmp.gt.f32.partialorder %v799_v53, 0.0 }
 0x1a7   : > { %v924_v56 = vsel %vm860_vm6, %v799_v53, %v892_v55 }
 0x1a8   : > { %1618 = vmatmul.msk.f32.gmra.mxu2 %vm633_vm2, %v924_v56 }
 0x1aa   : > { %v801_v57 = vpop.f32.mrf.mxu1 }
 0x1ab   : > { %v802_v58 = vadd.f32 %v2016_v45, %v801_v57  ;;  %v2089_v59 = vpop.f32.mrf.mxu2 }
 0x1ad   : > { %v893_v60 = vmul.f32 0.01, %v802_v58  ;;  %vm861_vm7 = vcmp.gt.f32.partialorder %v802_v58, 0.0 }
 0x1af   : > { %v925_v61 = vsel %vm861_vm7, %v802_v58, %v893_v60 }
 0x1b0   : > { %1619 = vmatmul.msk.f32.gmra.mxu2 %vm633_vm2, %v925_v61 }
 0x1b2   : > { %v804_v62 = vpop.f32.mrf.mxu1 }
 0x1b3   : > { %v805_v63 = vadd.f32 %v2016_v45, %v804_v62  ;;  %v2093_v0 = vpop.f32.mrf.mxu2 }
 0x1b5   : > { %v894_v1 = vmul.f32 0.01, %v805_v63  ;;  %vm862_vm8 = vcmp.gt.f32.partialorder %v805_v63, 0.0 }
 0x1b7   : > { %v926_v2 = vsel %vm862_vm8, %v805_v63, %v894_v1 }
 0x1b8   : > { %1620 = vmatmul.msk.f32.gmra.mxu2 %vm633_vm2, %v926_v2 }
 0x1ba   : > { %v807_v3 = vpop.f32.mrf.mxu1 }
 0x1bb   : > { %v808_v4 = vadd.f32 %v2016_v45, %v807_v3  ;;  %v2097_v5 = vpop.f32.mrf.mxu2  ;;  %v2137_v3 = vld [vmem:[%s2292_s4 + $0x1] ss:$0 sm:$0xff] }
 0x1bd   : > { %v895_v6 = vmul.f32 0.01, %v808_v4  ;;  %vm863_vm9 = vcmp.gt.f32.partialorder %v808_v4, 0.0 }
 0x1bf   : > { %v927_v7 = vsel %vm863_vm9, %v808_v4, %v895_v6 }
 0x1c0   : > { %1621 = vmatmul.msk.f32.gmra.mxu2 %vm633_vm2, %v927_v7 }
 0x1c2   : > { %v810_v8 = vpop.f32.mrf.mxu1 }
 0x1c3   : > { %v811_v9 = vadd.f32 %v2016_v45, %v810_v8  ;;  %v2101_v10 = vpop.f32.mrf.mxu2 }
 0x1c5   : > { %v896_v11 = vmul.f32 0.01, %v811_v9  ;;  %vm864_vm10 = vcmp.gt.f32.partialorder %v811_v9, 0.0 }
 0x1c7   : > { %v928_v12 = vsel %vm864_vm10, %v811_v9, %v896_v11 }
 0x1c8   : > { %1622 = vmatmul.msk.f32.gmra.mxu2 %vm633_vm2, %v928_v12 }
 0x1ca   : > { %v813_v13 = vpop.f32.mrf.mxu1 }
 0x1cb   : > { %v814_v14 = vadd.f32 %v2016_v45, %v813_v13  ;;  %v2105_v15 = vpop.f32.mrf.mxu2 }
 0x1cd   : > { %v897_v16 = vmul.f32 0.01, %v814_v14  ;;  %vm865_vm11 = vcmp.gt.f32.partialorder %v814_v14, 0.0 }
 0x1cf   : > { %v929_v17 = vsel %vm865_vm11, %v814_v14, %v897_v16 }
 0x1d0   : > { %1623 = vmatmul.msk.f32.gmra.mxu2 %vm633_vm2, %v929_v17 }
 0x1d2   : > { %v816_v18 = vpop.f32.mrf.mxu1 }
 0x1d3   : > { %v817_v19 = vadd.f32 %v2016_v45, %v816_v18  ;;  %v2109_v20 = vpop.f32.mrf.mxu2 }
 0x1d5   : > { %v898_v21 = vmul.f32 0.01, %v817_v19  ;;  %vm866_vm12 = vcmp.gt.f32.partialorder %v817_v19, 0.0 }
 0x1d7   : > { %v930_v23 = vsel %vm866_vm12, %v817_v19, %v898_v21 }
 0x1d8   : > { %1624 = vmatmul.msk.f32.gmra.mxu2 %vm633_vm2, %v930_v23 }
 0x1da   : > { %v819_v24 = vpop.f32.mrf.mxu1 }
 0x1db   : > { %v820_v25 = vadd.f32 %v2016_v45, %v819_v24  ;;  %v2113_v26 = vpop.f32.mrf.mxu2 }
 0x1dd   : > { %vm867_vm13 = vcmp.gt.f32.partialorder %v820_v25, 0.0  ;;  %v899_v27 = vmul.f32 0.01, %v820_v25 }
 0x1df   : > { %v931_v28 = vsel %vm867_vm13, %v820_v25, %v899_v27 }
 0x1e0   : > { %1625 = vmatmul.msk.f32.gmra.mxu2 %vm633_vm2, %v931_v28 }
 0x1e2   : > { %v822_v29 = vpop.f32.mrf.mxu1 }
 0x1e3   : > { %v823_v30 = vadd.f32 %v2016_v45, %v822_v29  ;;  %v2117_v31 = vpop.f32.mrf.mxu2 }
 0x1e5   : > { %vm868_vm14 = vcmp.gt.f32.partialorder %v823_v30, 0.0  ;;  %v900_v32 = vmul.f32 0.01, %v823_v30 }
 0x1e7   : > { %v932_v33 = vsel %vm868_vm14, %v823_v30, %v900_v32  ;;  %v1087_v32 = vadd.f32 %v2137_v3, %v2117_v31 }
 0x1e8   : > { %1626 = vmatmul.msk.f32.gmra.mxu2 %vm633_vm2, %v932_v33 }
 0x1e9   : > { %vm1166_vm13 = vcmp.gt.f32.partialorder %v1087_v32, 0.0 }
 0x1ea   : > { %v825_v34 = vpop.f32.mrf.mxu1 }
 0x1eb   : > { %v826_v35 = vadd.f32 %v2016_v45, %v825_v34  ;;  %v2121_v36 = vpop.f32.mrf.mxu2 }
 0x1ec   : > { %v1090_v27 = vadd.f32 %v2137_v3, %v2121_v36 }
 0x1ed   : > { %vm869_vm15 = vcmp.gt.f32.partialorder %v826_v35, 0.0  ;;  %v901_v37 = vmul.f32 0.01, %v826_v35 }
 0x1ee   : > { %v1199_v33 = vmul.f32 0.01, %v1090_v27  ;;  %vm1167_vm12 = vcmp.gt.f32.partialorder %v1090_v27, 0.0 }
 0x1ef   : > { %v933_v38 = vsel %vm869_vm15, %v826_v35, %v901_v37  ;;  %v1084_v35 = vadd.f32 %v2137_v3, %v2113_v26  ;;  %v1198_v37 = vmul.f32 0.01, %v1087_v32 }
 0x1f0   : > { %1627 = vmatmul.msk.f32.gmra.mxu2 %vm633_vm2, %v933_v38  ;;  %v1231_v36 = vsel %vm1167_vm12, %v1090_v27, %v1199_v33 }
 0x1f1   : > { %v1197_v31 = vmul.f32 0.01, %v1084_v35  ;;  %vm1165_vm14 = vcmp.gt.f32.partialorder %v1084_v35, 0.0 }
 0x1f2   : > { %v828_v39 = vpop.f32.mrf.mxu1 }
 0x1f3   : > { %v829_v40 = vadd.f32 %v2016_v45, %v828_v39  ;;  %v1092_v41 = vpop.f32.mrf.mxu2  ;;  %v1081_v39 = vadd.f32 %v2137_v3, %v2109_v20 }
 0x1f4   : > { %v1093_v23 = vadd.f32 %v2137_v3, %v1092_v41  ;;  %v1078_v41 = vadd.f32 %v2137_v3, %v2105_v15 }
 0x1f5   : > { %vm870_vm1 = vcmp.gt.f32.partialorder %v829_v40, 0.0  ;;  %v902_v42 = vmul.f32 0.01, %v829_v40  ;;  %v1196_v26 = vmul.f32 0.01, %v1081_v39  ;;  %vm1164_vm15 = vcmp.gt.f32.partialorder %v1081_v39, 0.0 }
 0x1f6   : > { %v1200_v28 = vmul.f32 0.01, %v1093_v23  ;;  %vm1168_vm11 = vcmp.gt.f32.partialorder %v1093_v23, 0.0  ;;  %v1195_v20 = vmul.f32 0.01, %v1078_v41 }
 0x1f7   : > { %v934_v43 = vsel %vm870_vm1, %v829_v40, %v902_v42  ;;  %v1230_v40 = vsel %vm1166_vm13, %v1087_v32, %v1198_v37  ;;  %v1229_v42 = vsel %vm1165_vm14, %v1084_v35, %v1197_v31  ;;  %vm1163_vm1 = vcmp.gt.f32.partialorder %v1078_v41, 0.0 }
 0x1f8   : > { %1628 = vmatmul.msk.f32.gmra.mxu2 %vm633_vm2, %v934_v43  ;;  %v1232_v34 = vsel %vm1168_vm11, %v1093_v23, %v1200_v28 }
 0x1fa   : > { %v831_v44 = vpop.f32.mrf.mxu1 }
 0x1fb   : > { %v832_v46 = vadd.f32 %v2016_v45, %v831_v44  ;;  %v1095_v47 = vpop.f32.mrf.mxu2  ;;  %v1075_v44 = vadd.f32 %v2137_v3, %v2101_v10 }
 0x1fc   : > { %v1096_v17 = vadd.f32 %v2137_v3, %v1095_v47  ;;  %v1072_v47 = vadd.f32 %v2137_v3, %v2097_v5 }
 0x1fd   : > { %vm871_vm3 = vcmp.gt.f32.partialorder %v832_v46, 0.0  ;;  %v903_v48 = vmul.f32 0.01, %v832_v46  ;;  %v1194_v15 = vmul.f32 0.01, %v1075_v44 }
 0x1fe   : > { %v1201_v24 = vmul.f32 0.01, %v1096_v17  ;;  %vm1169_vm10 = vcmp.gt.f32.partialorder %v1096_v17, 0.0  ;;  %v1193_v10 = vmul.f32 0.01, %v1072_v47 }
 0x1ff   : > { %v935_v49 = vsel %vm871_vm3, %v832_v46, %v903_v48  ;;  %v1228_v46 = vsel %vm1164_vm15, %v1081_v39, %v1196_v26  ;;  %v1227_v48 = vsel %vm1163_vm1, %v1078_v41, %v1195_v20  ;;  %vm1162_vm3 = vcmp.gt.f32.partialorder %v1075_v44, 0.0  ;;  %v1255_v41 = vld [vmem:[#allocation2] sm:$0x1] }
 0x200   : > { %1629 = vmatmul.msk.f32.gmra.mxu2 %vm633_vm2, %v935_v49  ;;  %v1233_v29 = vsel %vm1169_vm10, %v1096_v17, %v1201_v24  ;;  %v2206_v24 = vld [vmem:[%s2293_s5] sm:$0x1] }
 0x202   : > { %v834_v50 = vpop.f32.mrf.mxu1 }
 0x203   : > { %v835_v51 = vadd.f32 %v2016_v45, %v834_v50  ;;  %v1098_v22 = vpop.f32.mrf.mxu2  ;;  %v1069_v50 = vadd.f32 %v2137_v3, %v2093_v0 }
 0x204   : > { %v1099_v13 = vadd.f32 %v2137_v3, %v1098_v22  ;;  %v1066_v22 = vadd.f32 %v2137_v3, %v2089_v59 }
 0x205   : > { %vm872_vm4 = vcmp.gt.f32.partialorder %v835_v51, 0.0  ;;  %v904_v52 = vmul.f32 0.01, %v835_v51  ;;  %v1192_v5 = vmul.f32 0.01, %v1069_v50 }
 0x206   : > { %v1202_v18 = vmul.f32 0.01, %v1099_v13  ;;  %vm1170_vm9 = vcmp.gt.f32.partialorder %v1099_v13, 0.0  ;;  %v1191_v0 = vmul.f32 0.01, %v1066_v22 }
 0x207   : > { %v936_v53 = vsel %vm872_vm4, %v835_v51, %v904_v52  ;;  %v1226_v51 = vsel %vm1162_vm3, %v1075_v44, %v1194_v15  ;;  %vm1161_vm4 = vcmp.gt.f32.partialorder %v1072_v47, 0.0 }
 0x208   : > { %1630 = vmatmul.msk.f32.gmra.mxu2 %vm633_vm2, %v936_v53  ;;  %v1234_v25 = vsel %vm1170_vm9, %v1099_v13, %v1202_v18  ;;  %v1225_v52 = vsel %vm1161_vm4, %v1072_v47, %v1193_v10 }
 0x20a   : > { %v837_v55 = vpop.f32.mrf.mxu1 }
 0x20b   : > { %v838_v56 = vadd.f32 %v2016_v45, %v837_v55  ;;  %v1101_v57 = vpop.f32.mrf.mxu2  ;;  %v1063_v55 = vadd.f32 %v2137_v3, %v2085_v54 }
 0x20d   : > { %vm873_vm0 = vcmp.gt.f32.partialorder %v838_v56, 0.0  ;;  %v905_v58 = vmul.f32 0.01, %v838_v56 }
 0x20f   : > { %v937_v60 = vsel %vm873_vm0, %v838_v56, %v905_v58  ;;  %vm1160_vm0 = vcmp.gt.f32.partialorder %v1069_v50, 0.0  ;;  %v1190_v58 = vmul.f32 0.01, %v1063_v55 }
 0x210   : > { %1631 = vmatmul.msk.f32.gmra.mxu2 %vm633_vm2, %v937_v60  ;;  %v1224_v56 = vsel %vm1160_vm0, %v1069_v50, %v1192_v5 }
 0x212   : > { %v840_v61 = vpop.f32.mrf.mxu1 }
 0x213   : > { %v841_v62 = vadd.f32 %v2016_v45, %v840_v61  ;;  %v1104_v63 = vpop.f32.mrf.mxu2  ;;  %v1102_v45 = vadd.f32 %v2137_v3, %v1101_v57 }
 0x214   : > { %v1105_v6 = vadd.f32 %v2137_v3, %v1104_v63 }
 0x215   : > { %vm874_vm5 = vcmp.gt.f32.partialorder %v841_v62, 0.0  ;;  %v906_v1 = vmul.f32 0.01, %v841_v62  ;;  %v1203_v14 = vmul.f32 0.01, %v1102_v45  ;;  %vm1171_vm8 = vcmp.gt.f32.partialorder %v1102_v45, 0.0 }
 0x216   : > { %v1204_v9 = vmul.f32 0.01, %v1105_v6  ;;  %vm1172_vm7 = vcmp.gt.f32.partialorder %v1105_v6, 0.0 }
 0x217   : > { %v938_v2 = vsel %vm874_vm5, %v841_v62, %v906_v1  ;;  %v1235_v19 = vsel %vm1171_vm8, %v1102_v45, %v1203_v14  ;;  %vm1159_vm5 = vcmp.gt.f32.partialorder %v1066_v22, 0.0 }
 0x218   : > { %1632 = vmatmul.msk.f32.gmra.mxu2 %vm633_vm2, %v938_v2  ;;  %v1236_v16 = vsel %vm1172_vm7, %v1105_v6, %v1204_v9  ;;  %v1223_v57 = vsel %vm1159_vm5, %v1066_v22, %v1191_v0 }
 0x21b   : > { %v1107_v4 = vpop.f32.mrf.mxu2 }
 0x21c   : > { %v1108_v7 = vadd.f32 %v2137_v3, %v1107_v4 }
 0x21e   : > { %vm1173_vm6 = vcmp.gt.f32.partialorder %v1108_v7, 0.0  ;;  %v1205_v8 = vmul.f32 0.01, %v1108_v7 }
 0x220   : > { %v1237_v11 = vsel %vm1173_vm6, %v1108_v7, %v1205_v8  ;;  %vm1158_vm6 = vcmp.gt.f32.partialorder %v1063_v55, 0.0 }
 0x221   : > { %1633 = vmatpush.xpose.msk.msra.mxu3 %vm633_vm2, %v1237_v11  ;;  %v1222_v60 = vsel %vm1158_vm6, %v1063_v55, %v1190_v58 }
 0x223   : > { %v2143_v12 = vpop.f32.mrf.mxu2 }
 0x225   : > { %1634 = vmatpush.xpose.msk.msra.mxu3 %vm633_vm2, %v1236_v16 }
 0x229   : > { %1635 = vmatpush.xpose.msk.msra.mxu3 %vm633_vm2, %v1235_v19 }
 0x22b   : > { %v2149_v21 = vpop.f32.mrf.mxu2 }
 0x22d   : > { %1636 = vmatpush.xpose.msk.msra.mxu3 %vm633_vm2, %v1234_v25 }
 0x231   : > { %1637 = vmatpush.xpose.msk.msra.mxu3 %vm633_vm2, %v1233_v29 }
 0x233   : > { %v2156_v30 = vpop.f32.mrf.mxu2 }
 0x235   : > { %1638 = vmatpush.xpose.msk.msra.mxu3 %vm633_vm2, %v1232_v34 }
 0x239   : > { %1639 = vmatpush.xpose.msk.msra.mxu3 %vm633_vm2, %v1231_v36  ;;  %v1787_v36 = vmov 0  }
 0x23a   : > { %1711 = vset.pattern.permute.xlu0 %v1787_v36 }
 0x23b   : > { %v2164_v38 = vpop.f32.mrf.mxu2  ;;  %1258 = vperm.xlu0 %1711, %v1255_v41  }
 0x23d   : > { %1640 = vmatpush.xpose.msk.msra.mxu3 %vm633_vm2, %v1230_v40 }
 0x241   : > { %1641 = vmatpush.xpose.msk.msra.mxu3 %vm633_vm2, %v1229_v42 }
 0x243   : > { %v2172_v43 = vpop.f32.mrf.mxu2 }
 0x245   : > { %1642 = vmatpush.xpose.msk.msra.mxu3 %vm633_vm2, %v1228_v46 }
 0x249   : > { %1643 = vmatpush.xpose.msk.msra.mxu3 %vm633_vm2, %v1227_v48  ;;  %v1123_v48 = vadd.f32 %v2137_v3, %v2172_v43  ;;  %v1114_v43 = vadd.f32 %v2137_v3, %v2149_v21 }
 0x24b   : > { %v2180_v49 = vpop.f32.mrf.mxu2  ;;  %v1210_v10 = vmul.f32 0.01, %v1123_v48  ;;  %vm1178_vm4 = vcmp.gt.f32.partialorder %v1123_v48, 0.0  ;;  %vm1175_vm6 = vcmp.gt.f32.partialorder %v1114_v43, 0.0 }
 0x24c   : > { %v1126_v46 = vadd.f32 %v2137_v3, %v2180_v49  ;;  %v1117_v49 = vadd.f32 %v2137_v3, %v2156_v30 }
 0x24d   : > { %1644 = vmatpush.xpose.msk.msra.mxu3 %vm633_vm2, %v1226_v51  ;;  %v1120_v51 = vadd.f32 %v2137_v3, %v2164_v38  ;;  %v1242_v5 = vsel %vm1178_vm4, %v1123_v48, %v1210_v10  ;;  %v1111_v38 = vadd.f32 %v2137_v3, %v2143_v12 }
 0x24e   : > { %v1211_v15 = vmul.f32 0.01, %v1126_v46  ;;  %vm1179_vm3 = vcmp.gt.f32.partialorder %v1126_v46, 0.0  ;;  %vm1176_vm5 = vcmp.gt.f32.partialorder %v1117_v49, 0.0 }
 0x24f   : > { %vm1177_vm0 = vcmp.gt.f32.partialorder %v1120_v51, 0.0  ;;  %v1206_v30 = vmul.f32 0.01, %v1111_v38 }
 0x250   : > { %v1243_v22 = vsel %vm1179_vm3, %v1126_v46, %v1211_v15 }
 0x251   : > { %1645 = vmatpush.xpose.msk.msra.mxu3 %vm633_vm2, %v1225_v52  ;;  %v1209_v52 = vmul.f32 0.01, %v1120_v51 }
 0x253   : > { %v2188_v53 = vpop.f32.mrf.mxu2  ;;  %v1241_v55 = vsel %vm1177_vm0, %v1120_v51, %v1209_v52 }
 0x254   : > { %v1129_v42 = vadd.f32 %v2137_v3, %v2188_v53  ;;  %v1208_v53 = vmul.f32 0.01, %v1117_v49 }
 0x255   : > { %1646 = vmatpush.xpose.msk.msra.mxu3 %vm633_vm2, %v1224_v56  ;;  %v1207_v56 = vmul.f32 0.01, %v1114_v43 }
 0x256   : > { %v1212_v20 = vmul.f32 0.01, %v1129_v42  ;;  %vm1180_vm1 = vcmp.gt.f32.partialorder %v1129_v42, 0.0  ;;  %v1240_v0 = vsel %vm1176_vm5, %v1117_v49, %v1208_v53 }
 0x258   : > { %v1244_v50 = vsel %vm1180_vm1, %v1129_v42, %v1212_v20 }
 0x259   : > { %1647 = vmatpush.xpose.msk.msra.mxu3 %vm633_vm2, %v1223_v57  ;;  %v1239_v57 = vsel %vm1175_vm6, %v1114_v43, %v1207_v56 }
 0x25b   : > { %v1131_v59 = vpop.f32.mrf.mxu2 }
 0x25c   : > { %v1132_v39 = vadd.f32 %v2137_v3, %v1131_v59 }
 0x25d   : > { %1648 = vmatpush.xpose.msk.msra.mxu3 %vm633_vm2, %v1222_v60 }
 0x25e   : > { %v1213_v26 = vmul.f32 0.01, %v1132_v39  ;;  %vm1181_vm15 = vcmp.gt.f32.partialorder %v1132_v39, 0.0 }
 0x260   : > { %1649 = vmatmul.msk.f32.vlgmr.msra.gmra.mxu3 %vm633_vm2, %v2206_v24  ;;  %v1245_v47 = vsel %vm1181_vm15, %v1132_v39, %v1213_v26  ;;  %vm1442_vm15 = vcmask 1040384  }
 0x263   : > { %v1134_v61 = vpop.f32.mrf.mxu2 }
 0x264   : > { %v1135_v34 = vadd.f32 %v2137_v3, %v1134_v61 }
 0x266   : > { %v1214_v40 = vmul.f32 0.01, %v1135_v34  ;;  %vm1182_vm14 = vcmp.gt.f32.partialorder %v1135_v34, 0.0 }
 0x268   : > { %v1246_v44 = vsel %vm1182_vm14, %v1135_v34, %v1214_v40 }
 0x26b   : > { %v1137_v62 = vpop.f32.mrf.mxu2 }
 0x26c   : > { %v1138_v29 = vadd.f32 %v2137_v3, %v1137_v62 }
 0x26e   : > { %v1215_v35 = vmul.f32 0.01, %v1138_v29  ;;  %vm1183_vm13 = vcmp.gt.f32.partialorder %v1138_v29, 0.0 }
 0x270   : > { %v1247_v31 = vsel %vm1183_vm13, %v1138_v29, %v1215_v35  ;;  %v1445_v29 = vlaneseq }
 0x272   : > { %vm1447_vm1 = vcmp.lt.s32.totalorder %v1445_v29, 256 }
 0x273   : > { %v1140_v63 = vpop.f32.mrf.mxu2 }
 0x274   : > { %v1141_v25 = vadd.f32 %v2137_v3, %v1140_v63 }
 0x276   : > { %v1216_v32 = vmul.f32 0.01, %v1141_v25  ;;  %vm1184_vm12 = vcmp.gt.f32.partialorder %v1141_v25, 0.0 }
 0x278   : > { %v1248_v37 = vsel %vm1184_vm12, %v1141_v25, %v1216_v32 }
 0x27b   : > { %v1143_v1 = vpop.f32.mrf.mxu2 }
 0x27c   : > { %v1144_v18 = vadd.f32 %v2137_v3, %v1143_v1 }
 0x27e   : > { %v1217_v27 = vmul.f32 0.01, %v1144_v18  ;;  %vm1185_vm11 = vcmp.gt.f32.partialorder %v1144_v18, 0.0 }
 0x280   : > { %v1249_v33 = vsel %vm1185_vm11, %v1144_v18, %v1217_v27 }
 0x283   : > { %v1146_v2 = vpop.f32.mrf.mxu2 }
 0x284   : > { %v1147_v14 = vadd.f32 %v2137_v3, %v1146_v2 }
 0x286   : > { %v1218_v19 = vmul.f32 0.01, %v1147_v14  ;;  %vm1186_vm10 = vcmp.gt.f32.partialorder %v1147_v14, 0.0 }
 0x288   : > { %v1250_v28 = vsel %vm1186_vm10, %v1147_v14, %v1218_v19 }
 0x28b   : > { %v1149_v54 = vpop.f32.mrf.mxu2 }
 0x28c   : > { %v1150_v9 = vadd.f32 %v2137_v3, %v1149_v54 }
 0x28e   : > { %v1219_v16 = vmul.f32 0.01, %v1150_v9  ;;  %vm1187_vm9 = vcmp.gt.f32.partialorder %v1150_v9, 0.0 }
 0x290   : > { %v1251_v23 = vsel %vm1187_vm9, %v1150_v9, %v1219_v16 }
 0x293   : > { %v1152_v4 = vpop.f32.mrf.mxu2 }
 0x294   : > { %v1153_v7 = vadd.f32 %v2137_v3, %v1152_v4 }
 0x296   : > { %v1220_v11 = vmul.f32 0.01, %v1153_v7  ;;  %vm1188_vm8 = vcmp.gt.f32.partialorder %v1153_v7, 0.0 }
 0x298   : > { %v1252_v17 = vsel %vm1188_vm8, %v1153_v7, %v1220_v11 }
 0x29b   : > { %v1155_v6 = vpop.f32.mrf.mxu2 }
 0x29c   : > { %v1156_v8 = vadd.f32 %v2137_v3, %v1155_v6 }
 0x29e   : > { %v1221_v45 = vmul.f32 0.01, %v1156_v8  ;;  %vm1189_vm7 = vcmp.gt.f32.partialorder %v1156_v8, 0.0 }
 0x2a0   : > { %v1253_v13 = vsel %vm1189_vm7, %v1156_v8, %v1221_v45  ;;  %vm1174_vm7 = vcmp.gt.f32.partialorder %v1111_v38, 0.0 }
 0x2a1   : > { %1650 = vmatpush.xpose.msk.msrb.mxu3 %vm633_vm2, %v1253_v13  ;;  %v1238_v58 = vsel %vm1174_vm7, %v1111_v38, %v1206_v30 }
 0x2a5   : > { %1651 = vmatpush.xpose.msk.msrb.mxu3 %vm633_vm2, %v1252_v17 }
 0x2a9   : > { %1652 = vmatpush.xpose.msk.msrb.mxu3 %vm633_vm2, %v1251_v23 }
 0x2ad   : > { %1653 = vmatpush.xpose.msk.msrb.mxu3 %vm633_vm2, %v1250_v28  ;;  %v1259_v21 = vpop.permute.xlu0 %1258 }
 0x2ae   : > { %v1261_v59 = vperm.slane %v1259_v21, 0 }
 0x2b1   : > { %1654 = vmatpush.xpose.msk.msrb.mxu3 %vm633_vm2, %v1249_v33 }
 0x2b5   : > { %1655 = vmatpush.xpose.msk.msrb.mxu3 %vm633_vm2, %v1248_v37 }
 0x2b9   : > { %1656 = vmatpush.xpose.msk.msrb.mxu3 %vm633_vm2, %v1247_v31 }
 0x2bd   : > { %1657 = vmatpush.xpose.msk.msrb.mxu3 %vm633_vm2, %v1246_v44 }
 0x2c1   : > { %1658 = vmatpush.xpose.msk.msrb.mxu3 %vm633_vm2, %v1245_v47 }
 0x2c5   : > { %1659 = vmatpush.xpose.msk.msrb.mxu3 %vm633_vm2, %v1244_v50 }
 0x2c9   : > { %1660 = vmatpush.xpose.msk.msrb.mxu3 %vm633_vm2, %v1243_v22 }
 0x2cd   : > { %1661 = vmatpush.xpose.msk.msrb.mxu3 %vm633_vm2, %v1242_v5 }
 0x2d1   : > { %1662 = vmatpush.xpose.msk.msrb.mxu3 %vm633_vm2, %v1241_v55 }
 0x2d5   : > { %1663 = vmatpush.xpose.msk.msrb.mxu3 %vm633_vm2, %v1240_v0 }
 0x2d9   : > { %1664 = vmatpush.xpose.msk.msrb.mxu3 %vm633_vm2, %v1239_v57 }
 0x2dd   : > { %1665 = vmatpush.xpose.msk.msrb.mxu3 %vm633_vm2, %v1238_v58 }
 0x2e0   : > { %1666 = vmatmul.msk.f32.vlgmr.msrb.gmra.mxu3 %vm633_vm2, %v2206_v24 }
 0x2e3   : > { %v1378_v60 = vpop.f32.mrf.mxu3 }
 0x2e4   : > { %v1379_v3 = vadd.f32 %v1378_v60, %v1261_v59 }
 0x2e6   : > { %v1401_v12 = vsub.f32 0.0, %v1379_v3 }
 0x2e8   : > { %v1403_v61 = vmul.f32 1.442695, %v1401_v12 }
 0x2ea   : > { %1715 = vpow2.f32 %v1403_v61 }
 0x2f0   : > { %v1716_v62 = vpop.eup %1715 }
 0x2f1   : > { %v1407_v1 = vadd.f32 1.0, %v1716_v62 }
 0x2f3   : > { %1717 = vrcp.f32 %v1407_v1  ;;  %vm1414_vm2 = vweird.f32 %v1407_v1  ;;  %v1420_v18 = vand.u32 2147483648, %v1407_v1  ;;  %v1418_v24 = vand.u32 2147483647, %v1407_v1 }
 0x2f5   : > { %v1421_v32 = vor.u32 1.1754944e-38, %v1420_v18  ;;  %vm1419_vm13 = vcmp.eq.f32.partialorder %v1418_v24, 8.507059e+37 }
 0x2f9   : > { %v1718_v6 = vpop.eup %1717 }
 0x2fa   : > { %v1410_v8 = vmul.f32 %v1718_v6, %v1407_v1  ;;  %vm1415_vm8 = vweird.f32 %v1718_v6 }
 0x2fb   : > { %vm2249_vm10 = vmor %vm1414_vm2, %vm1415_vm8 }
 0x2fc   : > { %v1411_v9 = vsub.f32 1.0, %v1410_v8 }
 0x2fe   : > { %v1412_v13 = vmul.f32 %v1718_v6, %v1411_v9 }
 0x300   : > { %v1413_v17 = vadd.f32 %v1718_v6, %v1412_v13 }
 0x302   : > { %v1417_v34 = vsel %vm2249_vm10, %v1718_v6, %v1413_v17 }
 0x303   : > { %v1422_v39 = vsel %vm1419_vm13, %v1421_v32, %v1417_v34 }
 0x363   : > { %v1398_v63 = vpop.f32.mrf.mxu3 }
 0x364   : > { %v1399_v2 = vadd.f32 %v1398_v63, %v1261_v59 }
 0x366   : > { %v1402_v54 = vsub.f32 0.0, %v1399_v2 }
 0x368   : > { %v1405_v4 = vmul.f32 1.442695, %v1402_v54 }
 0x36a   : > { %1719 = vpow2.f32 %v1405_v4 }
 0x370   : > { %v1720_v7 = vpop.eup %1719 }
 0x371   : > { %v1408_v45 = vadd.f32 1.0, %v1720_v7 }
 0x373   : > { %1721 = vrcp.f32 %v1408_v45  ;;  %v1435_v19 = vand.u32 2147483648, %v1408_v45  ;;  %v1433_v25 = vand.u32 2147483647, %v1408_v45  ;;  %vm1429_vm11 = vweird.f32 %v1408_v45 }
 0x375   : > { %v1436_v33 = vor.u32 1.1754944e-38, %v1435_v19  ;;  %vm1434_vm14 = vcmp.eq.f32.partialorder %v1433_v25, 8.507059e+37 }
 0x379   : > { %v1722_v11 = vpop.eup %1721 }
 0x37a   : > { %v1425_v14 = vmul.f32 %v1722_v11, %v1408_v45  ;;  %vm1430_vm9 = vweird.f32 %v1722_v11 }
 0x37b   : > { %vm1431_vm12 = vmor %vm1429_vm11, %vm1430_vm9 }
 0x37c   : > { %v1426_v16 = vsub.f32 1.0, %v1425_v14 }
 0x37e   : > { %v1427_v23 = vmul.f32 %v1722_v11, %v1426_v16 }
 0x380   : > { %v1428_v28 = vadd.f32 %v1722_v11, %v1427_v23 }
 0x382   : > { %v1432_v35 = vsel %vm1431_vm12, %v1722_v11, %v1428_v28 }
 0x383   : > { %v1437_v37 = vsel %vm1434_vm14, %v1436_v33, %v1432_v35 }
 0x384   : > { %v1441_v36 = vrot.slane %v1437_v37, 7 }
 0x386   : > { %v1443_v40 = vsel %vm1442_vm15, %v1422_v39, %v1441_v36 }
 0x387   : > { %1449 = vst.msk [vmem:[%s274_s6] sm:$0x3] %vm1447_vm1, %v1443_v40 }
 0x388   : > { %1750 = shalt.err (!%p1747_p3)
}
 0x389   : > { %1671 = dma.vmem_to_hbm [thread:$0]  (%p1869_p5), %s1464_s22, 32, %s1466_s23, %s1451_s24  }
 0x38a PF: > { %p1677_p4 = scmp.ge.s32.totalorder %s1785_s29, 2  ;;  %s1477_s15 = sand.u32 1, %s1773_s26  }
 0x38b   : > { %s1478_s17 = scalar_lea.sflag [#allocation4], %s1477_s15 }
 0x38c   : > { %p1674_p7 = pnand %p1677_p4, %p1873_p6 }
 0x38e   : > { %p1675_p8 = pneg %p1674_p7 }
 0x390   : > { %1768 = dma.done.wait (%p1675_p8), %s1478_s17, 32  }
 0x391   : > { %1770 = vsyncadd (%p1675_p8), %s1478_s17, 4294967264  ;;  %p19_p9 = scmp.ge.s32.totalorder %s1856_s8, 4   ;;  %s2300_s26 = smov %s1777_s27 }
 0x392   : > { %s2301_s27 = smov %s1781_s28  ;;  %s2302_s28 = smov %s1867_s11 }
 0x393   : > { %s2303_s29 = smov %s1856_s8  ;;  %21 = sbr.rel (!%p19_p9) target bundleno = 6 (0x6), region = 85 }
 0x398   :  { %1484 = vsyncpa [#allocation4], 1 }
 0x399   :  { %1486 = vsyncpa [#allocation4 + $0x1], 1 }

</bundles_post_ra>
